<compile_context>
chip_gen: v7x
topology: tpu7x:2x2x1
jax: 0.10.0
libtpu: 0.0.40
codegen_flags: <defaults>
</compile_context>

<pallas_src>
import functools

import jax
import jax.numpy as jnp
from jax.experimental import pallas as pl
from jax.experimental.pallas import tpu as pltpu

LANE = 128
TARGET_BLOCK_BYTES = 4 * 1024 * 1024  # ~4 MiB per-step block (roofline sweet spot)


def _row_dim_semantics():
    """CORE_PARALLEL on v7x (2 TCs/chip) so both cores stream HBM; plain
    "parallel" elsewhere (single-TC v5e/v6e), which is what ran clean before."""
    try:
        kind = jax.devices()[0].device_kind.lower()
    except Exception:  # pragma: no cover - defensive
        kind = ""
    if ("v7" in kind or "7x" in kind) and hasattr(pltpu, "CORE_PARALLEL"):
        return (pltpu.CORE_PARALLEL,)
    return ("parallel",)


_DIM_SEMANTICS = _row_dim_semantics()


def mix2_kernel(w_ref, x_ref, o_ref):
    # w_ref: (1,) scalar parameter in SMEM
    # x_ref / o_ref: (block_rows, lane_cols) lane-dense tiles in VMEM
    mix_factor = jnp.maximum(w_ref[0], jnp.float32(0.0))       # ReLU(w), scalar slot
    o_ref[...] = x_ref[...] * mix_factor.astype(o_ref.dtype)   # native-dtype VPU mul


@functools.partial(jax.jit, static_argnames=("max_lane_cols",))
def mix2_forward(x, w, *, max_lane_cols=4096):
    """out = x * ReLU(w).  x: any-shape tensor (NCHW in TSNet2), w: scalar param."""
    orig_shape, orig_dtype = x.shape, x.dtype
    total = x.size
    itemsize = orig_dtype.itemsize
    w1d = jnp.asarray(w, jnp.float32).reshape(1)

    max_lc = max(LANE, (max_lane_cols // LANE) * LANE)

    # --- lane-dense 2D layout; avoid pad/slice full-tensor copies when possible.
    lane_cols = 0
    for c in range(max_lc, 0, -LANE):          # largest multiple of 128 dividing total
        if total % c == 0:
            lane_cols = c
            break

    padded = lane_cols == 0
    if padded:
        # Rare fallback: total not a multiple of 128 -> minimal pad to whole rows.
        lane_cols = min(max_lc, pl.cdiv(total, LANE) * LANE)
        rows = pl.cdiv(total, lane_cols)
        flat = jnp.pad(x.reshape(-1), (0, rows * lane_cols - total))
    else:
        rows = total // lane_cols
        flat = x.reshape(-1)                   # bitcast reshape, no HBM copy
    x2d = flat.reshape(rows, lane_cols)

    # --- row tile: ~4 MiB per block; multiple of 8 sublanes or the full extent.
    br = max(1, TARGET_BLOCK_BYTES // (lane_cols * itemsize))
    if br >= rows:
        br = rows                              # full extent (always legal)
    else:
        br = max(8, (br // 8) * 8)
    num_blocks = pl.cdiv(rows, br)             # ragged last block masked by Pallas

    out2d = pl.pallas_call(
        mix2_kernel,
        out_shape=jax.ShapeDtypeStruct((rows, lane_cols), orig_dtype),
        grid=(num_blocks,),
        in_specs=[
            pl.BlockSpec(memory_space=pltpu.SMEM),             # w (scalar)
            pl.BlockSpec((br, lane_cols), lambda i: (i, 0)),   # x row tile
        ],
        out_specs=pl.BlockSpec((br, lane_cols), lambda i: (i, 0)),
        compiler_params=pltpu.CompilerParams(
            dimension_semantics=_DIM_SEMANTICS,
            vmem_limit_bytes=32 * 1024 * 1024,  # 4 MiB blocks x (2 in + 2 out) = 16 MiB
        ),
        # Alias only when the buffer is genuinely ours to donate (padded copy);
        # aliasing the caller's non-donated x would trigger a defensive copy.
        input_output_aliases={1: 0} if padded else {},
    )(w1d, x2d)

    out_flat = out2d.reshape(-1)
    if padded:
        out_flat = out_flat[:total]
    return out_flat.reshape(orig_shape)


if __name__ == "__main__":
    key = jax.random.PRNGKey(0)

    # Small NCHW input (TSNet2 applies Mix2 to feature maps / skip tensors).
    x = jax.random.normal(key, (2, 4, 16, 16), dtype=jnp.float32)

    # TSNet2.mix1 uses m=0.6 (positive -> ReLU passes it through) ...
    w_pos = jnp.array([0.6], dtype=jnp.float32)
    out = jax.block_until_ready(mix2_forward(x, w_pos))
    ref = x * jnp.maximum(w_pos[0], 0.0)
    assert out.shape == x.shape and out.dtype == x.dtype
    assert jnp.allclose(out, ref, atol=1e-6, rtol=1e-6)

    # ... and the Mix2 default m=-0.8 (negative -> ReLU clamps the scale to 0).
    w_neg = jnp.array([-0.8], dtype=jnp.float32)
    out_neg = jax.block_until_ready(mix2_forward(x, w_neg))
    assert jnp.allclose(out_neg, jnp.zeros_like(x), atol=1e-6, rtol=1e-6)

    # Larger map: exercises the multi-step grid with a ragged last row-block
    # (total = 1_179_648 -> lane_cols=4096, rows=288, br=256 -> 2 blocks).
    x_big = jax.random.normal(jax.random.PRNGKey(1), (2, 48, 96, 128), dtype=jnp.float32)
    out_big = jax.block_until_ready(mix2_forward(x_big, w_pos))
    ref_big = x_big * jnp.maximum(w_pos[0], 0.0)
    assert jnp.allclose(out_big, ref_big, atol=1e-6, rtol=1e-6)

    # Odd size: exercises the rare padded fallback path (total=189, not %128).
    x_odd = jax.random.normal(jax.random.PRNGKey(2), (1, 3, 7, 9), dtype=jnp.float32)
    out_odd = jax.block_until_ready(mix2_forward(x_odd, w_pos))
    ref_odd = x_odd * jnp.maximum(w_pos[0], 0.0)
    assert jnp.allclose(out_odd, ref_odd, atol=1e-6, rtol=1e-6)

    print("KERNEL_OK")
</pallas_src>

<mosaic_0001>
module attributes {stable_mosaic.version = 11 : i64} {
  func.func @mix2_kernel(%arg0: i32, %arg1: memref<1xf32, #tpu.memory_space<smem>>, %arg2: memref<1x2048xf32, #tpu.memory_space<vmem>>, %arg3: memref<1x2048xf32, #tpu.memory_space<vmem>>) attributes {dimension_semantics = [#tpu.dimension_semantics<parallel>], iteration_bounds = array<i64: 1>, scalar_prefetch = 0 : i64, scratch_operands = 0 : i64, tpu.core_type = #tpu.core_type<tc>, window_params = [{transform_indices = @transform_0, window_bounds = array<i64: 1>}, {transform_indices = @transform_1, window_bounds = array<i64: 1, 2048>}, {transform_indices = @transform_2, window_bounds = array<i64: 1, 2048>}]} {
    %c0 = arith.constant 0 : index
    %0 = memref.load %arg1[%c0] : memref<1xf32, #tpu.memory_space<smem>>
    %cst = arith.constant 0.000000e+00 : f32
    %1 = arith.maximumf %0, %cst : f32
    %c0_0 = arith.constant 0 : index
    %c0_1 = arith.constant 0 : index
    %2 = vector.load %arg2[%c0_0, %c0_1] : memref<1x2048xf32, #tpu.memory_space<vmem>>, vector<1x2048xf32>
    %3 = vector.broadcast %1 : f32 to vector<1x2048xf32>
    %4 = arith.mulf %2, %3 : vector<1x2048xf32>
    %c0_2 = arith.constant 0 : index
    %c0_3 = arith.constant 0 : index
    %5 = vector.load %arg3[%c0_2, %c0_3] : memref<1x2048xf32, #tpu.memory_space<vmem>>, vector<1x2048xf32>
    tpu.vector_store %arg3[%c0_2, %c0_3], %4 {strides = array<i32>} : memref<1x2048xf32, #tpu.memory_space<vmem>>, vector<1x2048xf32>,
    return
  }
  func.func @transform_0(%arg0: i32) -> i32 {
    %c0_i32 = arith.constant 0 : i32
    %c0_i32_0 = arith.constant 0 : i32
    return %c0_i32 : i32
  }
  func.func @transform_1(%arg0: i32) -> (i32, i32) {
    %c0_i32 = arith.constant 0 : i32
    %c0_i32_0 = arith.constant 0 : i32
    return %arg0, %c0_i32 : i32, i32
  }
  func.func @transform_2(%arg0: i32) -> (i32, i32) {
    %c0_i32 = arith.constant 0 : i32
    %c0_i32_0 = arith.constant 0 : i32
    return %arg0, %c0_i32 : i32, i32
  }
}

</mosaic_0001>

<bundles_post_ra>
// kernel: mix2_forward.1
= control target key start
LH: loop header
LB: loop body
LE: loop exit
PB: predicated region body
PF: predicated region fallthrough
CT: control target
= control target key end

     0   :  { %s26_s9 = smov 0.0   ;;  %s57_s0 = inlined_call_operand.<no memory space> [shape: f32[1], index: 0, kind: input, shape index: {}]   ;;  %s58_s1 = inlined_call_operand.vmem [shape: f32[1,2048], index: 1, kind: input, shape index: {}]   ;;  %s59_s2 = inlined_call_operand.vmem [shape: f32[1,2048], index: 2, kind: output, shape index: {}]  }
   0x1   :  { %s13_s12 = smax.f32 %s26_s9, %s57_s0  ;;  %v14_v0 = vld [vmem:[%s58_s1] sm:$0xff]  ;;  %v15_v1 = vld [vmem:[%s58_s1 + $0x8] sm:$0xff] }
   0x2   :  { %v16_v2 = vstv %s13_s12 }
   0x3   :  { %v17_v3 = vmul.f32 %v16_v2, %v14_v0  ;;  %v18_v4 = vmul.f32 %v16_v2, %v15_v1 }
   0x5   :  { %19 = vst [vmem:[%s59_s2] sm:$0xff] %v17_v3  ;;  %20 = vst [vmem:[%s59_s2 + $0x8] sm:$0xff] %v18_v4 }

</bundles_post_ra>
